<compile_context>
chip_gen: v7x
topology: tpu7x:2x2x1
jax: 0.10.0
libtpu: 0.0.40
codegen_flags: <defaults>
</compile_context>

<pallas_src>
import math

import jax
import jax.numpy as jnp
from jax.experimental import pallas as pl
from jax.experimental.pallas import tpu as pltpu

_LANE = 128


def _make_pe(d_model: int, max_len: int = 512) -> jnp.ndarray:
    """Deterministic buffer identical to the PyTorch __init__ (register_buffer 'pe')."""
    position = jnp.arange(0, max_len, dtype=jnp.float32)[:, None]            # (max_len, 1)
    div_term = jnp.exp(jnp.arange(0, d_model, 2, dtype=jnp.float32)
                       * (-math.log(10000.0) / d_model))                     # (ceil(d/2),)
    pe = jnp.zeros((max_len, d_model), dtype=jnp.float32)
    pe = pe.at[:, 0::2].set(jnp.sin(position * div_term))
    n_odd = pe[:, 1::2].shape[1]
    pe = pe.at[:, 1::2].set(jnp.cos(position * div_term[:n_odd]))
    return pe[None, :, :]                                                    # (1, max_len, d_model)


def _add_pe_kernel(x_ref, pe_ref, o_ref):
    # x_ref: (tb, tl)   pe_ref: (1, tl) -> sublane broadcast of pe over the batch rows.
    # The add runs in o_ref.dtype (promoted dtype) for torch promotion parity.
    o_ref[...] = x_ref[...].astype(o_ref.dtype) + pe_ref[...]


def _tpu_budgets():
    """(per-block byte budget, vmem_limit_bytes) picked per TPU generation."""
    try:
        kind = jax.devices()[0].device_kind.lower()
    except Exception:
        kind = ""
    if "v2" in kind or "v3" in kind:
        return 1 << 20, None            # tiny physical VMEM: stay under defaults
    if "v5 lite" in kind or "v5e" in kind or "v5lite" in kind:
        return 2 << 20, 32 << 20        # v5e: 16 MiB scoped default, 128 MiB physical
    return 4 << 20, 32 << 20            # v6e / v7x (and v4/v5p): 32 MiB scoped default


def _choose_tiles(B, L, itemsize, max_block_bytes, min_lane_steps=8):
    """Pick (tb, tl): sublane(batch)/lane tile sizes for the (B, L) view.

    tl is a multiple of 128 (or the full L when L < 128); tb is the full B when the
    (B, tl) block fits the byte budget, else a multiple of 8. Ragged edges are left
    to the cdiv grid + Pallas masking, so neither tile has to divide its extent.
    """
    cap_elems = max(max_block_bytes // max(itemsize, 1), _LANE)

    if L <= _LANE:
        tl = L                                      # full (possibly <128) lane extent
    else:
        tl = (L // _LANE) * _LANE                   # largest aligned lane tile
        # Keep >= min_lane_steps lane blocks once L is big enough (DMA pipelining +
        # v7x megacore), but never drop below 512 lanes (knee of the tile-size curve).
        if L >= min_lane_steps * _LANE:
            steps_cap = max(4 * _LANE, (pl.cdiv(L, min_lane_steps) // _LANE) * _LANE)
            tl = min(tl, steps_cap)
        # Fit a block of at least min(B, 8) rows inside the byte budget.
        rows = B if B <= 8 else 8
        tl = min(tl, max(_LANE, (cap_elems // rows) // _LANE * _LANE))

    # Batch (sublane) tile: full B when it fits the budget, else a multiple of 8.
    if B <= 8 or B * tl <= cap_elems:
        tb = B
    else:
        tb = min(B, max(8, (cap_elems // max(tl, 1)) // 8 * 8))
    return tb, tl


def _positional_encoding_forward(x: jnp.ndarray, pe: jnp.ndarray) -> jnp.ndarray:
    """x: (B, S, D); pe: (1, max_len, D) float32. Returns x + pe[:, :S] with torch
    type promotion (add computed in promote_types(x.dtype, pe.dtype))."""
    B, S, D = x.shape
    L = S * D
    out_dtype = jnp.promote_types(x.dtype, pe.dtype)

    # Layout plumbing only (bitcasts under jit): lane-dense (B, S*D) views.
    x2 = x.reshape(B, L)
    pe2 = pe[:, :S, :].astype(out_dtype).reshape(1, L)

    budget, vmem_limit = _tpu_budgets()
    itemsize = max(x.dtype.itemsize, out_dtype.itemsize)
    tb, tl = _choose_tiles(B, L, itemsize, budget)
    grid = (pl.cdiv(B, tb), pl.cdiv(L, tl))         # ragged last blocks masked by Pallas

    grid_spec = pltpu.PrefetchScalarGridSpec(
        num_scalar_prefetch=0,
        grid=grid,
        in_specs=[
            pl.BlockSpec((tb, tl), lambda i, j: (i, j)),   # x chunk: tb rows x tl lanes
            pl.BlockSpec((1, tl), lambda i, j: (0, j)),    # pe chunk: one DMA per lane tile
        ],
        out_specs=pl.BlockSpec((tb, tl), lambda i, j: (i, j)),
    )

    # In-place write-back only when the output really has x's dtype.
    aliases = {0: 0} if x.dtype == out_dtype else {}

    out2 = pl.pallas_call(
        _add_pe_kernel,
        out_shape=jax.ShapeDtypeStruct((B, L), out_dtype),
        grid_spec=grid_spec,
        compiler_params=pltpu.CompilerParams(
            dimension_semantics=("parallel", "parallel"),  # shardable over v7x's 2 TCs
            vmem_limit_bytes=vmem_limit,
        ),
        input_output_aliases=aliases,
    )(x2, pe2)

    return out2.reshape(B, S, D)


# jit + donation: the reshapes above become layout-only bitcasts and the pallas
# input_output_aliases really reuses the caller's x buffer (no extra HBM passes).
positional_encoding_forward = jax.jit(_positional_encoding_forward, donate_argnums=(0,))

# TODO(synk): for tiny B with huge S*D, a (R, C) re-layout with a modulo pe index_map
# would also pack sublanes densely; skipped since the op stays DMA-bound (~10-20% cap).


if __name__ == "__main__":
    d_model = 32
    max_len = 512
    batch = 2
    seq = 8

    pe = _make_pe(d_model, max_len)

    key = jax.random.PRNGKey(0)
    x = jax.random.normal(key, (batch, seq, d_model), dtype=jnp.float32)

    # Pure-JAX reference, materialized before x is donated to the jitted kernel.
    ref = jax.block_until_ready(x + pe[:, :seq, :])

    out = positional_encoding_forward(x, pe)
    out = jax.block_until_ready(out)

    assert out.shape == (batch, seq, d_model)
    assert out.dtype == ref.dtype
    assert jnp.allclose(out, ref, atol=1e-6, rtol=1e-6), "mismatch vs reference"

    print("KERNEL_OK")
</pallas_src>

<mosaic_0001>
module attributes {stable_mosaic.version = 11 : i64} {
  func.func @_add_pe_kernel(%arg0: i32, %arg1: i32, %arg2: memref<2x256xf32, #tpu.memory_space<vmem>>, %arg3: memref<1x256xf32, #tpu.memory_space<vmem>>, %arg4: memref<2x256xf32, #tpu.memory_space<vmem>>) attributes {dimension_semantics = [#tpu.dimension_semantics<parallel>, #tpu.dimension_semantics<parallel>], iteration_bounds = array<i64: 1, 1>, scalar_prefetch = 0 : i64, scratch_operands = 0 : i64, tpu.core_type = #tpu.core_type<tc>, window_params = [{transform_indices = @transform_0, window_bounds = array<i64: 2, 256>}, {transform_indices = @transform_1, window_bounds = array<i64: 1, 256>}, {transform_indices = @transform_2, window_bounds = array<i64: 2, 256>}]} {
    %c0 = arith.constant 0 : index
    %c0_0 = arith.constant 0 : index
    %0 = vector.load %arg2[%c0, %c0_0] : memref<2x256xf32, #tpu.memory_space<vmem>>, vector<2x256xf32>
    %c0_1 = arith.constant 0 : index
    %c0_2 = arith.constant 0 : index
    %1 = vector.load %arg3[%c0_1, %c0_2] : memref<1x256xf32, #tpu.memory_space<vmem>>, vector<1x256xf32>
    %2 = vector.broadcast %1 : vector<1x256xf32> to vector<2x256xf32>
    %3 = arith.addf %0, %2 : vector<2x256xf32>
    %c0_3 = arith.constant 0 : index
    %c0_4 = arith.constant 0 : index
    %4 = vector.load %arg4[%c0_3, %c0_4] : memref<2x256xf32, #tpu.memory_space<vmem>>, vector<2x256xf32>
    tpu.vector_store %arg4[%c0_3, %c0_4], %3 {strides = array<i32>} : memref<2x256xf32, #tpu.memory_space<vmem>>, vector<2x256xf32>,
    return
  }
  func.func @transform_0(%arg0: i32, %arg1: i32) -> (i32, i32) {
    %c0_i32 = arith.constant 0 : i32
    return %arg0, %arg1 : i32, i32
  }
  func.func @transform_1(%arg0: i32, %arg1: i32) -> (i32, i32) {
    %c0_i32 = arith.constant 0 : i32
    %c0_i32_0 = arith.constant 0 : i32
    return %c0_i32, %arg1 : i32, i32
  }
  func.func @transform_2(%arg0: i32, %arg1: i32) -> (i32, i32) {
    %c0_i32 = arith.constant 0 : i32
    return %arg0, %arg1 : i32, i32
  }
}

</mosaic_0001>

<bundles_post_ra>
// kernel: _positional_encoding_forward.1
= control target key start
LH: loop header
LB: loop body
LE: loop exit
PB: predicated region body
PF: predicated region fallthrough
CT: control target
= control target key end

     0   :  { %v14_v0 = vlaneseq  ;;  %v38_v1 = vmov 1983009808   ;;  %s63_s1 = inlined_call_operand.vmem [shape: f32[1,256], index: 1, kind: input, shape index: {}]   ;;  %s64_s0 = inlined_call_operand.vmem [shape: f32[2,256], index: 0, kind: input, shape index: {}, may-alias: {0,2}]   ;;  %s65_s2 = inlined_call_operand.vmem [shape: f32[2,256], index: 2, kind: output, shape index: {}, may-alias: {0,2}]  }
   0x1   :  { %v24_v2 = vunpack.c.l.s4 %v38_v1  ;;  %v12_v4 = vld [vmem:[%s63_s1] sm:$0x3] }
   0x2   :  { %v15_v3 = vshrl.u32 %v14_v0, 7  ;;  %v11_v12 = vld [vmem:[%s64_s0] sm:$0xf] }
   0x3   :  { %v25_v5 = vunpack.c.0.s8 %v24_v2 }
   0x4   :  { %v16_v6 = vsub.s32 0, %v15_v3  ;;  %v20_v7 = vsub.s32 1, %v15_v3 }
   0x5   :  { %v28_v10 = vsub.s32 %v25_v5, %v15_v3 }
   0x6   :  { %v17_v8 = vrot.slane %v12_v4, %v16_v6  ;;  %v21_v9 = vrot.slane %v12_v4, %v20_v7 }
   0x8   :  { %v22_v11 = vcombine.low %v17_v8, %v21_v9 }
   0xa   :  { %v29_v13 = vrot.slane %v22_v11, %v28_v10 }
   0xc   :  { %v31_v14 = vadd.f32 %v29_v13, %v11_v12 }
   0xe   :  { %32 = vst [vmem:[%s65_s2] sm:$0xf] %v31_v14 }

</bundles_post_ra>
